<compile_context>
chip_gen: v7x
topology: tpu7x:2x2x1
jax: 0.10.0
libtpu: 0.0.40
codegen_flags: <defaults>
</compile_context>

<pallas_src>
import functools
from typing import List, Optional

import jax
import jax.numpy as jnp
from jax.experimental import pallas as pl
from jax.experimental.pallas import tpu as pltpu


# ----------------------------------------------------------------------------
# Tiling configuration / helpers
# ----------------------------------------------------------------------------
_LANE = 128
_TK_MAX = 8192
_TM_NARROW = 256            # M-tile cap for narrow-N (small output) layers
_TM_WIDE = 128              # M-tile cap for wide-N layers (big f32 output blocks)
_WTILE_NARROW = 4 * 1024 * 1024   # target streamed weight-tile bytes (narrow N)
_WTILE_WIDE = 2 * 1024 * 1024     # target streamed weight-tile bytes (wide N)
_FUSE_THRESHOLD_DEFAULT = 2 * 1024 * 1024  # layers below this weight size get fused


def _round_up(x: int, m: int) -> int:
    return ((x + m - 1) // m) * m


def _two_tensorcores() -> bool:
    """True on v7x-class parts (2 TensorCores); degrade gracefully otherwise."""
    try:
        kind = jax.devices()[0].device_kind.lower()
    except Exception:
        kind = ""
    return ("v7" in kind) or ("7x" in kind)


def _pick_tile(dim: int, target: int, align: int = _LANE, max_waste: float = 0.02):
    """Return (tile, padded_dim): tile is a multiple of `align` <= target, tile | padded_dim,
    and padding waste is kept small (we control the padding of this axis)."""
    d_al = _round_up(dim, align)
    target = max(align, (target // align) * align)
    if d_al <= target:
        return d_al, d_al
    best = None
    t = target
    while t >= align:
        padded = _round_up(dim, t)
        key = (padded, -t)
        if best is None or key < best[0]:
            best = (key, t, padded)
        if padded - dim <= max_waste * dim:
            return t, padded
        t -= align
    return best[1], best[2]


def _pick_divisor_tile(padded_dim: int, target: int, align: int = _LANE) -> int:
    """Largest multiple of `align` <= target that divides padded_dim (fallback: align)."""
    t = max(align, min((target // align) * align, padded_dim))
    while t > align:
        if padded_dim % t == 0:
            return t
        t -= align
    return align


def _stream_tiles(in_f: int, out_f: int, *, in_fixed_pad, out_chained: bool,
                  two_cores: bool):
    """Choose (Kp, Np, tk, tn, tm_cap) for a streamed (weight-heavy) Linear layer."""
    Np_nat = _round_up(out_f, _LANE)
    if Np_nat <= 512:
        # Narrow output (e.g. FLAT_DIM -> 512).  Keep N in 1 block (single TC) or
        # 2 blocks (v7x) and make the K tile as big as the weight-tile budget allows.
        if two_cores and Np_nat >= 2 * _LANE:
            tn = _pick_divisor_tile(Np_nat, Np_nat // 2)
        else:
            tn = Np_nat
        Np = Np_nat
        tk_target = max(512, min(_TK_MAX, _WTILE_NARROW // (2 * tn)))
        if in_fixed_pad is not None:
            Kp = in_fixed_pad
            tk = _pick_divisor_tile(Kp, tk_target)
        else:
            tk, Kp = _pick_tile(in_f, tk_target)
        tm_cap = _TM_NARROW
    else:
        # Wide output (e.g. regression head 128 -> FLAT_DIM): stream big N tiles.
        if in_fixed_pad is not None:
            Kp = in_fixed_pad
            tk = _pick_divisor_tile(Kp, 2048)
        else:
            tk, Kp = _pick_tile(in_f, 2048)
        tn_target = max(_LANE, _WTILE_WIDE // (2 * tk))
        if out_chained:
            Np = Np_nat
            tn = _pick_divisor_tile(Np, tn_target)
        else:
            tn, Np = _pick_tile(out_f, tn_target)
        tm_cap = _TM_WIDE
    return Kp, Np, tk, tn, tm_cap


# ----------------------------------------------------------------------------
# Kernel 1: streaming Linear  y = act(x @ W + b)  (weight-heavy layers)
#   grid = (M blocks, N blocks, K blocks); K innermost ("arbitrary").
#   f32 VMEM scratch accumulator; bf16 (chained) or f32 (final) output.
# ----------------------------------------------------------------------------
def _stream_linear_kernel(x_ref, w_ref, b_ref, o_ref, acc_ref, *, activation):
    k = pl.program_id(2)

    @pl.when(k == 0)
    def _init():
        acc_ref[...] = jnp.zeros_like(acc_ref)

    acc_ref[...] += jnp.dot(x_ref[...], w_ref[...],
                            preferred_element_type=jnp.float32)

    @pl.when(k == pl.num_programs(2) - 1)
    def _finalize():
        y = acc_ref[...] + b_ref[...]          # (1, tn) bias broadcasts over rows
        if activation == "relu":
            y = jnp.maximum(y, 0.0)
        elif activation == "sigmoid":
            y = jax.nn.sigmoid(y)
        o_ref[...] = y.astype(o_ref.dtype)


def _stream_linear(xp, wp, bp, *, Kp, Np, tk, tn, tm, activation, out_dtype,
                   vmem_limit):
    Mp = xp.shape[0]
    grid = (Mp // tm, Np // tn, Kp // tk)
    return pl.pallas_call(
        functools.partial(_stream_linear_kernel, activation=activation),
        out_shape=jax.ShapeDtypeStruct((Mp, Np), out_dtype),
        grid_spec=pltpu.PrefetchScalarGridSpec(
            num_scalar_prefetch=0,
            grid=grid,
            in_specs=[
                pl.BlockSpec((tm, tk), lambda i, j, k: (i, k)),   # activations
                pl.BlockSpec((tk, tn), lambda i, j, k: (k, j)),   # streamed weights
                pl.BlockSpec((1, tn), lambda i, j, k: (0, j)),    # bias
            ],
            out_specs=pl.BlockSpec((tm, tn), lambda i, j, k: (i, j)),
            scratch_shapes=[pltpu.VMEM((tm, tn), jnp.float32)],
        ),
        compiler_params=pltpu.CompilerParams(
            dimension_semantics=("parallel", "parallel", "arbitrary"),
            vmem_limit_bytes=vmem_limit,
        ),
    )(xp, wp, bp)


# ----------------------------------------------------------------------------
# Kernel 2: fused small MLP  (all weights resident in VMEM, one launch)
#   grid = (M blocks,), everything else full-block.
# ----------------------------------------------------------------------------
def _fused_mlp_kernel(*refs, activations):
    n = len(activations)
    x_ref = refs[0]
    o_ref = refs[-1]
    h = x_ref[...]
    for i, act in enumerate(activations):
        w_ref = refs[1 + 2 * i]
        b_ref = refs[2 + 2 * i]
        y = jnp.dot(h, w_ref[...], preferred_element_type=jnp.float32) + b_ref[...]
        if act == "relu":
            y = jnp.maximum(y, 0.0)
        elif act == "sigmoid":
            y = jax.nn.sigmoid(y)
        h = y.astype(jnp.bfloat16) if i + 1 < n else y
    o_ref[...] = h.astype(o_ref.dtype)


def _fused_mlp(xp, wbs, *, layer_pads, activations, out_dtype, tm, vmem_limit):
    Mp, K0p = xp.shape
    Np_last = layer_pads[-1][1]
    in_specs = [pl.BlockSpec((tm, K0p), lambda i: (i, 0))]
    flat_args = [xp]
    for (wp, bp), (Kp, Np) in zip(wbs, layer_pads):
        in_specs.append(pl.BlockSpec((Kp, Np), lambda i: (0, 0)))
        in_specs.append(pl.BlockSpec((1, Np), lambda i: (0, 0)))
        flat_args.append(wp)
        flat_args.append(bp)
    return pl.pallas_call(
        functools.partial(_fused_mlp_kernel, activations=tuple(activations)),
        out_shape=jax.ShapeDtypeStruct((Mp, Np_last), out_dtype),
        grid_spec=pltpu.PrefetchScalarGridSpec(
            num_scalar_prefetch=0,
            grid=(Mp // tm,),
            in_specs=in_specs,
            out_specs=pl.BlockSpec((tm, Np_last), lambda i: (i, 0)),
        ),
        compiler_params=pltpu.CompilerParams(
            dimension_semantics=("parallel",),
            vmem_limit_bytes=vmem_limit,
        ),
    )(*flat_args)


# ----------------------------------------------------------------------------
# Jitted forward: pad input once, chain padded bf16 activations through segments.
# ----------------------------------------------------------------------------
def _forward_impl(params, x, *, seg_cfgs, in_pad0, flat_dim, out_features,
                  task, img_shape, vmem_limit):
    M = x.shape[0]
    h = x.reshape(M, -1).astype(jnp.bfloat16)        # == torch.flatten(x, 1)

    Mp = _round_up(M, 16) if M <= 128 else _round_up(M, _LANE)
    pad_rows = Mp - M
    pad_cols = in_pad0 - flat_dim
    if pad_rows or pad_cols:
        h = jnp.pad(h, ((0, pad_rows), (0, pad_cols)))   # explicit zero pad

    for cfg, p in zip(seg_cfgs, params):
        tm = _pick_divisor_tile(Mp, cfg["tm_cap"], align=16)
        if cfg["kind"] == "stream":
            wp, bp = p
            h = _stream_linear(h, wp, bp, Kp=cfg["Kp"], Np=cfg["Np"],
                               tk=cfg["tk"], tn=cfg["tn"], tm=tm,
                               activation=cfg["activation"],
                               out_dtype=cfg["out_dtype"], vmem_limit=vmem_limit)
        else:
            h = _fused_mlp(h, p, layer_pads=cfg["layer_pads"],
                           activations=cfg["activations"],
                           out_dtype=cfg["out_dtype"], tm=tm,
                           vmem_limit=vmem_limit)

    out = h[:M, :out_features].astype(jnp.float32)
    if task == "regression":
        out = out.reshape(M, *img_shape)
    return out


# ----------------------------------------------------------------------------
# FFNN model (deterministic init mirroring the PyTorch module)
# ----------------------------------------------------------------------------
class FFNN:
    def __init__(self, *, task: str = "classification", num_classes: int = 3,
                 hidden_sizes: Optional[List[int]] = None,
                 img_shape=(3, 100, 200), key=None,
                 fuse_threshold_bytes: int = _FUSE_THRESHOLD_DEFAULT):
        assert task in {"classification", "regression"}
        self.task = task
        self.img_shape = tuple(img_shape)
        self.flat_dim = img_shape[0] * img_shape[1] * img_shape[2]
        hidden_sizes = list(hidden_sizes) if hidden_sizes else [512, 256, 128]

        sizes = [self.flat_dim] + hidden_sizes
        layers = [(i, o, "relu") for i, o in zip(sizes[:-1], sizes[1:])]
        if task == "classification":
            layers.append((sizes[-1], num_classes, "none"))
        else:
            layers.append((sizes[-1], self.flat_dim, "sigmoid"))
        self.out_features = layers[-1][1]

        two_cores = _two_tensorcores()
        self._vmem_limit = (48 if two_cores else 64) * 1024 * 1024

        def _wbytes(in_f, out_f):
            return _round_up(in_f, _LANE) * _round_up(out_f, _LANE) * 2

        # Group consecutive small layers into fused segments; heavy layers stream.
        segments = []
        for lyr in layers:
            if _wbytes(lyr[0], lyr[1]) > fuse_threshold_bytes:
                segments.append(("stream", [lyr]))
            elif segments and segments[-1][0] == "fused":
                segments[-1][1].append(lyr)
            else:
                segments.append(("fused", [lyr]))

        key = key if key is not None else jax.random.PRNGKey(0)
        seg_cfgs, seg_params = [], []
        in_pad = None                       # padded width of the chained activation
        for si, (kind, lyrs) in enumerate(segments):
            is_last_seg = (si == len(segments) - 1)
            out_dtype = jnp.float32 if is_last_seg else jnp.bfloat16
            if kind == "stream":
                in_f, out_f, act = lyrs[0]
                Kp, Np, tk, tn, tm_cap = _stream_tiles(
                    in_f, out_f, in_fixed_pad=in_pad,
                    out_chained=not is_last_seg, two_cores=two_cores)
                key, wk = jax.random.split(key)
                seg_params.append(self._init_padded(wk, in_f, out_f, Kp, Np))
                seg_cfgs.append(dict(kind="stream", K=in_f, N=out_f, Kp=Kp, Np=Np,
                                     tk=tk, tn=tn, tm_cap=tm_cap, activation=act,
                                     out_dtype=out_dtype))
                in_pad = Np
            else:
                cur_in = in_pad if in_pad is not None else _round_up(lyrs[0][0], _LANE)
                first_in = cur_in
                pads, acts, dims, params = [], [], [], []
                for in_f, out_f, act in lyrs:
                    Kp, Np = cur_in, _round_up(out_f, _LANE)
                    key, wk = jax.random.split(key)
                    params.append(self._init_padded(wk, in_f, out_f, Kp, Np))
                    pads.append((Kp, Np))
                    acts.append(act)
                    dims.append((in_f, out_f))
                    cur_in = Np
                seg_params.append(tuple(params))
                seg_cfgs.append(dict(kind="fused", in_pad=first_in,
                                     layer_pads=tuple(pads), activations=tuple(acts),
                                     layer_dims=tuple(dims), tm_cap=_TM_NARROW,
                                     out_dtype=out_dtype))
                in_pad = cur_in

        self.params = tuple(seg_params)
        self._seg_cfgs = tuple(seg_cfgs)
        first = self._seg_cfgs[0]
        self._in_pad0 = first["Kp"] if first["kind"] == "stream" else first["in_pad"]

        self._forward = jax.jit(functools.partial(
            _forward_impl, seg_cfgs=self._seg_cfgs, in_pad0=self._in_pad0,
            flat_dim=self.flat_dim, out_features=self.out_features,
            task=self.task, img_shape=self.img_shape, vmem_limit=self._vmem_limit))

    @staticmethod
    def _init_padded(wk, in_f, out_f, Kp, Np):
        # kaiming_normal_(nonlinearity='relu'), fan_in mode: std = sqrt(2/in_f); zero bias.
        std = (2.0 / in_f) ** 0.5
        w = (jax.random.normal(wk, (in_f, out_f), dtype=jnp.float32) * std
             ).astype(jnp.bfloat16)
        wp = jnp.zeros((Kp, Np), jnp.bfloat16).at[:in_f, :out_f].set(w)
        bp = jnp.zeros((1, Np), jnp.float32)
        return wp, bp

    def __call__(self, x):
        # x: (B, C, H, W) NCHW, flattened like torch.flatten(x, 1)
        return self._forward(self.params, x)


# ----------------------------------------------------------------------------
# Reference (plain JAX, same bf16 weights / bf16 activation chaining)
# ----------------------------------------------------------------------------
def _reference_forward(model: FFNN, x):
    M = x.shape[0]
    h = x.reshape(M, -1).astype(jnp.bfloat16)
    flat = []
    for cfg, p in zip(model._seg_cfgs, model.params):
        if cfg["kind"] == "stream":
            flat.append(((cfg["K"], cfg["N"], cfg["activation"]), p))
        else:
            for (in_f, out_f), act, wb in zip(cfg["layer_dims"], cfg["activations"], p):
                flat.append(((in_f, out_f, act), wb))
    n = len(flat)
    for i, ((K, N, act), (wp, bp)) in enumerate(flat):
        y = jnp.dot(h, wp[:K, :N], preferred_element_type=jnp.float32) + bp[0, :N]
        if act == "relu":
            y = jnp.maximum(y, 0.0)
        elif act == "sigmoid":
            y = jax.nn.sigmoid(y)
        h = y.astype(jnp.bfloat16) if i + 1 < n else y
    h = h.astype(jnp.float32)
    if model.task == "regression":
        h = h.reshape(M, *model.img_shape)
    return h


if __name__ == "__main__":
    # Scaled-down stand-ins for IMG_SHAPE=(3,100,200) / hidden=[512,256,128].
    img_shape = (3, 16, 32)
    hidden_sizes = [128, 64, 32]
    batch = 2

    key = jax.random.PRNGKey(0)
    k_x, k_cls, k_reg = jax.random.split(key, 3)
    x = jax.random.normal(k_x, (batch,) + img_shape, dtype=jnp.float32)

    # Small fuse threshold so BOTH kernels are exercised at toy sizes:
    # layer 0 and the regression head use the streaming kernel, the middle
    # layers (and classification head) use the fused-MLP kernel.
    clf = FFNN(task="classification", num_classes=3, hidden_sizes=hidden_sizes,
               img_shape=img_shape, key=k_cls, fuse_threshold_bytes=64 * 1024)
    out = jax.block_until_ready(clf(x))
    assert out.shape == (batch, 3), out.shape
    ref = jax.block_until_ready(_reference_forward(clf, x))
    assert jnp.allclose(out, ref, atol=2e-2, rtol=2e-2), "classification mismatch"

    reg = FFNN(task="regression", hidden_sizes=hidden_sizes, img_shape=img_shape,
               key=k_reg, fuse_threshold_bytes=64 * 1024)
    out_r = jax.block_until_ready(reg(x))
    assert out_r.shape == (batch,) + img_shape, out_r.shape
    ref_r = jax.block_until_ready(_reference_forward(reg, x))
    assert jnp.allclose(out_r, ref_r, atol=2e-2, rtol=2e-2), "regression mismatch"

    print("KERNEL_OK")
</pallas_src>

<mosaic_0001>
module attributes {stable_mosaic.version = 11 : i64} {
  func.func @_stream_linear_kernel(%arg0: i32, %arg1: i32, %arg2: i32, %arg3: memref<16x1536xbf16, #tpu.memory_space<vmem>>, %arg4: memref<1536x128xbf16, #tpu.memory_space<vmem>>, %arg5: memref<1x128xf32, #tpu.memory_space<vmem>>, %arg6: memref<16x128xbf16, #tpu.memory_space<vmem>>, %arg7: memref<16x128xf32, #tpu.memory_space<vmem>>) attributes {dimension_semantics = [#tpu.dimension_semantics<parallel>, #tpu.dimension_semantics<parallel>, #tpu.dimension_semantics<arbitrary>], iteration_bounds = array<i64: 1, 1, 1>, scalar_prefetch = 0 : i64, scratch_operands = 1 : i64, tpu.core_type = #tpu.core_type<tc>, window_params = [{transform_indices = @transform_0, window_bounds = array<i64: 16, 1536>}, {transform_indices = @transform_1, window_bounds = array<i64: 1536, 128>}, {transform_indices = @transform_2, window_bounds = array<i64: 1, 128>}, {transform_indices = @transform_3, window_bounds = array<i64: 16, 128>}]} {
    %c0_i32 = arith.constant 0 : i32
    %0 = arith.cmpi eq, %arg2, %c0_i32 : i32
    %1 = arith.extui %0 : i1 to i32
    %c0_i32_0 = arith.constant 0 : i32
    %2 = arith.cmpi ne, %1, %c0_i32_0 : i32
    scf.if %2 {
      %cst_10 = arith.constant 0.000000e+00 : f32
      %12 = vector.broadcast %cst_10 : f32 to vector<16x128xf32>
      %c0_11 = arith.constant 0 : index
      %c0_12 = arith.constant 0 : index
      %13 = vector.load %arg7[%c0_11, %c0_12] : memref<16x128xf32, #tpu.memory_space<vmem>>, vector<16x128xf32>
      tpu.vector_store %arg7[%c0_11, %c0_12], %12 {strides = array<i32>} : memref<16x128xf32, #tpu.memory_space<vmem>>, vector<16x128xf32>,
    } else {
    }
    %c0 = arith.constant 0 : index
    %c0_1 = arith.constant 0 : index
    %3 = vector.load %arg7[%c0, %c0_1] : memref<16x128xf32, #tpu.memory_space<vmem>>, vector<16x128xf32>
    %c0_2 = arith.constant 0 : index
    %c0_3 = arith.constant 0 : index
    %4 = vector.load %arg3[%c0_2, %c0_3] : memref<16x1536xbf16, #tpu.memory_space<vmem>>, vector<16x1536xbf16>
    %c0_4 = arith.constant 0 : index
    %c0_5 = arith.constant 0 : index
    %5 = vector.load %arg4[%c0_4, %c0_5] : memref<1536x128xbf16, #tpu.memory_space<vmem>>, vector<1536x128xbf16>
    %cst = arith.constant dense<0.000000e+00> : vector<16x128xf32>
    %6 = tpu.matmul %4, %5, %cst {dimension_numbers = #tpu.dot_dimension_numbers<[1], [0], [0], [1], [0, 0, 1, 1], [], []>} : vector<16x1536xbf16>, vector<1536x128xbf16>, vector<16x128xf32> -> vector<16x128xf32>
    %7 = arith.addf %3, %6 : vector<16x128xf32>
    %c0_6 = arith.constant 0 : index
    %c0_7 = arith.constant 0 : index
    %8 = vector.load %arg7[%c0_6, %c0_7] : memref<16x128xf32, #tpu.memory_space<vmem>>, vector<16x128xf32>
    tpu.vector_store %arg7[%c0_6, %c0_7], %7 {strides = array<i32>} : memref<16x128xf32, #tpu.memory_space<vmem>>, vector<16x128xf32>,
    %c0_i32_8 = arith.constant 0 : i32
    %9 = arith.cmpi eq, %arg2, %c0_i32_8 : i32
    %10 = arith.extui %9 : i1 to i32
    %c0_i32_9 = arith.constant 0 : i32
    %11 = arith.cmpi ne, %10, %c0_i32_9 : i32
    scf.if %11 {
      %c0_10 = arith.constant 0 : index
      %c0_11 = arith.constant 0 : index
      %12 = vector.load %arg7[%c0_10, %c0_11] : memref<16x128xf32, #tpu.memory_space<vmem>>, vector<16x128xf32>
      %c0_12 = arith.constant 0 : index
      %c0_13 = arith.constant 0 : index
      %13 = vector.load %arg5[%c0_12, %c0_13] : memref<1x128xf32, #tpu.memory_space<vmem>>, vector<1x128xf32>
      %14 = vector.broadcast %13 : vector<1x128xf32> to vector<16x128xf32>
      %15 = arith.addf %12, %14 : vector<16x128xf32>
      %cst_14 = arith.constant 0.000000e+00 : f32
      %16 = vector.broadcast %cst_14 : f32 to vector<16x128xf32>
      %17 = arith.maximumf %15, %16 : vector<16x128xf32>
      %18 = arith.truncf %17 : vector<16x128xf32> to vector<16x128xbf16>
      %c0_15 = arith.constant 0 : index
      %c0_16 = arith.constant 0 : index
      %19 = vector.load %arg6[%c0_15, %c0_16] : memref<16x128xbf16, #tpu.memory_space<vmem>>, vector<16x128xbf16>
      tpu.vector_store %arg6[%c0_15, %c0_16], %18 {strides = array<i32>} : memref<16x128xbf16, #tpu.memory_space<vmem>>, vector<16x128xbf16>,
    } else {
    }
    return
  }
  func.func @transform_0(%arg0: i32, %arg1: i32, %arg2: i32) -> (i32, i32) {
    %c0_i32 = arith.constant 0 : i32
    return %arg0, %arg2 : i32, i32
  }
  func.func @transform_1(%arg0: i32, %arg1: i32, %arg2: i32) -> (i32, i32) {
    %c0_i32 = arith.constant 0 : i32
    return %arg2, %arg1 : i32, i32
  }
  func.func @transform_2(%arg0: i32, %arg1: i32, %arg2: i32) -> (i32, i32) {
    %c0_i32 = arith.constant 0 : i32
    %c0_i32_0 = arith.constant 0 : i32
    return %c0_i32, %arg1 : i32, i32
  }
  func.func @transform_3(%arg0: i32, %arg1: i32, %arg2: i32) -> (i32, i32) {
    %c0_i32 = arith.constant 0 : i32
    return %arg0, %arg1 : i32, i32
  }
}

module attributes {stable_mosaic.version = 11 : i64} {
  func.func @_fused_mlp_kernel(%arg0: i32, %arg1: memref<16x128xbf16, #tpu.memory_space<vmem>>, %arg2: memref<128x128xbf16, #tpu.memory_space<vmem>>, %arg3: memref<1x128xf32, #tpu.memory_space<vmem>>, %arg4: memref<128x128xbf16, #tpu.memory_space<vmem>>, %arg5: memref<1x128xf32, #tpu.memory_space<vmem>>, %arg6: memref<128x128xbf16, #tpu.memory_space<vmem>>, %arg7: memref<1x128xf32, #tpu.memory_space<vmem>>, %arg8: memref<16x128xf32, #tpu.memory_space<vmem>>) attributes {dimension_semantics = [#tpu.dimension_semantics<parallel>], iteration_bounds = array<i64: 1>, scalar_prefetch = 0 : i64, scratch_operands = 0 : i64, tpu.core_type = #tpu.core_type<tc>, window_params = [{transform_indices = @transform_0, window_bounds = array<i64: 16, 128>}, {pipeline_mode = #tpu.pipeline_mode<synchronous>, transform_indices = @transform_1, window_bounds = array<i64: 128, 128>}, {pipeline_mode = #tpu.pipeline_mode<synchronous>, transform_indices = @transform_2, window_bounds = array<i64: 1, 128>}, {pipeline_mode = #tpu.pipeline_mode<synchronous>, transform_indices = @transform_3, window_bounds = array<i64: 128, 128>}, {pipeline_mode = #tpu.pipeline_mode<synchronous>, transform_indices = @transform_4, window_bounds = array<i64: 1, 128>}, {pipeline_mode = #tpu.pipeline_mode<synchronous>, transform_indices = @transform_5, window_bounds = array<i64: 128, 128>}, {pipeline_mode = #tpu.pipeline_mode<synchronous>, transform_indices = @transform_6, window_bounds = array<i64: 1, 128>}, {transform_indices = @transform_7, window_bounds = array<i64: 16, 128>}]} {
    %c0 = arith.constant 0 : index
    %c0_0 = arith.constant 0 : index
    %0 = vector.load %arg1[%c0, %c0_0] : memref<16x128xbf16, #tpu.memory_space<vmem>>, vector<16x128xbf16>
    %c0_1 = arith.constant 0 : index
    %c0_2 = arith.constant 0 : index
    %1 = vector.load %arg2[%c0_1, %c0_2] : memref<128x128xbf16, #tpu.memory_space<vmem>>, vector<128x128xbf16>
    %cst = arith.constant dense<0.000000e+00> : vector<16x128xf32>
    %2 = tpu.matmul %0, %1, %cst {dimension_numbers = #tpu.dot_dimension_numbers<[1], [0], [0], [1], [0, 0, 1, 1], [], []>} : vector<16x128xbf16>, vector<128x128xbf16>, vector<16x128xf32> -> vector<16x128xf32>
    %c0_3 = arith.constant 0 : index
    %c0_4 = arith.constant 0 : index
    %3 = vector.load %arg3[%c0_3, %c0_4] : memref<1x128xf32, #tpu.memory_space<vmem>>, vector<1x128xf32>
    %4 = vector.broadcast %3 : vector<1x128xf32> to vector<16x128xf32>
    %5 = arith.addf %2, %4 : vector<16x128xf32>
    %cst_5 = arith.constant 0.000000e+00 : f32
    %6 = vector.broadcast %cst_5 : f32 to vector<16x128xf32>
    %7 = arith.maximumf %5, %6 : vector<16x128xf32>
    %8 = arith.truncf %7 : vector<16x128xf32> to vector<16x128xbf16>
    %c0_6 = arith.constant 0 : index
    %c0_7 = arith.constant 0 : index
    %9 = vector.load %arg4[%c0_6, %c0_7] : memref<128x128xbf16, #tpu.memory_space<vmem>>, vector<128x128xbf16>
    %cst_8 = arith.constant dense<0.000000e+00> : vector<16x128xf32>
    %10 = tpu.matmul %8, %9, %cst_8 {dimension_numbers = #tpu.dot_dimension_numbers<[1], [0], [0], [1], [0, 0, 1, 1], [], []>} : vector<16x128xbf16>, vector<128x128xbf16>, vector<16x128xf32> -> vector<16x128xf32>
    %c0_9 = arith.constant 0 : index
    %c0_10 = arith.constant 0 : index
    %11 = vector.load %arg5[%c0_9, %c0_10] : memref<1x128xf32, #tpu.memory_space<vmem>>, vector<1x128xf32>
    %12 = vector.broadcast %11 : vector<1x128xf32> to vector<16x128xf32>
    %13 = arith.addf %10, %12 : vector<16x128xf32>
    %cst_11 = arith.constant 0.000000e+00 : f32
    %14 = vector.broadcast %cst_11 : f32 to vector<16x128xf32>
    %15 = arith.maximumf %13, %14 : vector<16x128xf32>
    %16 = arith.truncf %15 : vector<16x128xf32> to vector<16x128xbf16>
    %c0_12 = arith.constant 0 : index
    %c0_13 = arith.constant 0 : index
    %17 = vector.load %arg6[%c0_12, %c0_13] : memref<128x128xbf16, #tpu.memory_space<vmem>>, vector<128x128xbf16>
    %cst_14 = arith.constant dense<0.000000e+00> : vector<16x128xf32>
    %18 = tpu.matmul %16, %17, %cst_14 {dimension_numbers = #tpu.dot_dimension_numbers<[1], [0], [0], [1], [0, 0, 1, 1], [], []>} : vector<16x128xbf16>, vector<128x128xbf16>, vector<16x128xf32> -> vector<16x128xf32>
    %c0_15 = arith.constant 0 : index
    %c0_16 = arith.constant 0 : index
    %19 = vector.load %arg7[%c0_15, %c0_16] : memref<1x128xf32, #tpu.memory_space<vmem>>, vector<1x128xf32>
    %20 = vector.broadcast %19 : vector<1x128xf32> to vector<16x128xf32>
    %21 = arith.addf %18, %20 : vector<16x128xf32>
    %c0_17 = arith.constant 0 : index
    %c0_18 = arith.constant 0 : index
    %22 = vector.load %arg8[%c0_17, %c0_18] : memref<16x128xf32, #tpu.memory_space<vmem>>, vector<16x128xf32>
    tpu.vector_store %arg8[%c0_17, %c0_18], %21 {strides = array<i32>} : memref<16x128xf32, #tpu.memory_space<vmem>>, vector<16x128xf32>,
    return
  }
  func.func @transform_0(%arg0: i32) -> (i32, i32) {
    %c0_i32 = arith.constant 0 : i32
    %c0_i32_0 = arith.constant 0 : i32
    return %arg0, %c0_i32 : i32, i32
  }
  func.func @transform_1(%arg0: i32) -> (i32, i32) {
    %c0_i32 = arith.constant 0 : i32
    %c0_i32_0 = arith.constant 0 : i32
    %c0_i32_1 = arith.constant 0 : i32
    return %c0_i32, %c0_i32_0 : i32, i32
  }
  func.func @transform_2(%arg0: i32) -> (i32, i32) {
    %c0_i32 = arith.constant 0 : i32
    %c0_i32_0 = arith.constant 0 : i32
    %c0_i32_1 = arith.constant 0 : i32
    return %c0_i32, %c0_i32_0 : i32, i32
  }
  func.func @transform_3(%arg0: i32) -> (i32, i32) {
    %c0_i32 = arith.constant 0 : i32
    %c0_i32_0 = arith.constant 0 : i32
    %c0_i32_1 = arith.constant 0 : i32
    return %c0_i32, %c0_i32_0 : i32, i32
  }
  func.func @transform_4(%arg0: i32) -> (i32, i32) {
    %c0_i32 = arith.constant 0 : i32
    %c0_i32_0 = arith.constant 0 : i32
    %c0_i32_1 = arith.constant 0 : i32
    return %c0_i32, %c0_i32_0 : i32, i32
  }
  func.func @transform_5(%arg0: i32) -> (i32, i32) {
    %c0_i32 = arith.constant 0 : i32
    %c0_i32_0 = arith.constant 0 : i32
    %c0_i32_1 = arith.constant 0 : i32
    return %c0_i32, %c0_i32_0 : i32, i32
  }
  func.func @transform_6(%arg0: i32) -> (i32, i32) {
    %c0_i32 = arith.constant 0 : i32
    %c0_i32_0 = arith.constant 0 : i32
    %c0_i32_1 = arith.constant 0 : i32
    return %c0_i32, %c0_i32_0 : i32, i32
  }
  func.func @transform_7(%arg0: i32) -> (i32, i32) {
    %c0_i32 = arith.constant 0 : i32
    %c0_i32_0 = arith.constant 0 : i32
    return %arg0, %c0_i32 : i32, i32
  }
}

</mosaic_0001>

<bundles_post_ra>
// kernel: _forward_impl.3
= control target key start
LH: loop header
LB: loop body
LE: loop exit
PB: predicated region body
PF: predicated region fallthrough
CT: control target
= control target key end

     0   :  { %12 = vsyncpa [#allocation3], 0  ;;  %s1035_s0 = inlined_call_operand.hbm [shape: bf16[16,128], index: 0, kind: input, shape index: {}]   ;;  %s1036_s1 = inlined_call_operand.hbm [shape: bf16[128,128], index: 1, kind: input, shape index: {}]   ;;  %s1037_s2 = inlined_call_operand.hbm [shape: f32[1,128], index: 2, kind: input, shape index: {}]   ;;  %s1038_s3 = inlined_call_operand.hbm [shape: bf16[128,128], index: 3, kind: input, shape index: {}]   ;;  %s1039_s4 = inlined_call_operand.hbm [shape: f32[1,128], index: 4, kind: input, shape index: {}]   ;;  %s1040_s5 = inlined_call_operand.hbm [shape: bf16[128,128], index: 5, kind: input, shape index: {}]   ;;  %s1041_s6 = inlined_call_operand.hbm [shape: f32[1,128], index: 6, kind: input, shape index: {}]   ;;  %s1042_s7 = inlined_call_operand.hbm [shape: f32[16,128], index: 7, kind: output, shape index: {}]  }
   0x1   :  { %13 = vsyncpa [#allocation6], 0 }
   0x2   :  { %14 = vsyncpa [#allocation9], 0 }
   0x3   :  { %15 = vsyncpa [#allocation12], 0 }
   0x4   :  { %16 = vsyncpa [#allocation4], 0  ;;  %s829_s24 = smov [#allocation5]   ;;  %s830_s26 = smov [#allocation8]  }
   0x5   :  { %s34_s25 = sshll.u32 %s829_s24, 4  ;;  %s56_s27 = sshll.u32 %s830_s26, 4  ;;  %s35_s25 = int_to_ptr.vmem [resolvable:$true] %s34_s25  ;;  %s883_s27 = int_to_ptr.vmem [resolvable:$true] %s56_s27 }
   0x6   :  { %s643_s30 = scalar_lea.hbm %s1036_s1, 1024 }
   0x7   :  { %p644_p0 = scmp.ne.s32.totalorder %s1036_s1, %s643_s30  ;;  %p647_p1 = scmp.lt.u32.totalorder %s643_s30, %s1036_s1 }
   0x9   :  { %p649_p2 = pnand %p647_p1, %p644_p0 }
   0xb   :  { %652 = shalt.err (!%p649_p2)
}
   0xc   :  { %s653_s12 = scalar_lea.vmem %s35_s25, 1024  ;;  %p658_p4 = scmp.lt.s32.totalorder %s35_s25, %s35_s25 }
   0xd   :  { %p654_p3 = scmp.ne.s32.totalorder %s35_s25, %s653_s12  ;;  %p659_p5 = scmp.lt.s32.totalorder %s653_s12, %s653_s12 }
   0xf   :  { %p660_p6 = por %p659_p5, %p658_p4 }
  0x11   :  { %p661_p7 = pnand %p660_p6, %p654_p3 }
  0x13   :  { %664 = shalt.err (!%p661_p7)
}
  0x14   :  { %s831_s13 = smov 64   ;;  %s832_s14 = smov 4  }
  0x15   :  { %40 = dma.hbm_to_vmem [thread:$0]  %s1036_s1, 1024, %s35_s25, [#allocation6], %s831_s13, %s831_s13, %s832_s14  }
  0x16   :  { %s665_s19 = scalar_lea.hbm %s1038_s3, 1024 }
  0x17   :  { %p666_p8 = scmp.ne.s32.totalorder %s1038_s3, %s665_s19  ;;  %p669_p9 = scmp.lt.u32.totalorder %s665_s19, %s1038_s3 }
  0x19   :  { %p671_p10 = pnand %p669_p9, %p666_p8 }
  0x1b   :  { %674 = shalt.err (!%p671_p10)
}
  0x1c   :  { %s675_s24 = scalar_lea.vmem %s883_s27, 1024  ;;  %p680_p12 = scmp.lt.s32.totalorder %s883_s27, %s883_s27 }
  0x1d   :  { %p676_p11 = scmp.ne.s32.totalorder %s883_s27, %s675_s24  ;;  %p681_p13 = scmp.lt.s32.totalorder %s675_s24, %s675_s24 }
  0x1f   :  { %p682_p0 = por %p681_p13, %p680_p12 }
  0x21   :  { %p683_p1 = pnand %p682_p0, %p676_p11 }
  0x23   :  { %686 = shalt.err (!%p683_p1)
}
  0x24   :  { %62 = dma.hbm_to_vmem [thread:$0]  %s1038_s3, 1024, %s883_s27, [#allocation9], %s831_s13, %s831_s13, %s832_s14  }
  0x25   :  { %s833_s26 = smov [#allocation11]   ;;  %s834_s29 = smov [#allocation2]  }
  0x26   :  { %s78_s28 = sshll.u32 %s833_s26, 4  ;;  %s22_s30 = sshll.u32 %s834_s29, 4  ;;  %s79_s28 = int_to_ptr.vmem [resolvable:$true] %s78_s28  ;;  %s920_s30 = int_to_ptr.vmem [resolvable:$true] %s22_s30 }
  0x27   :  { %s687_s10 = scalar_lea.hbm %s1040_s5, 1024 }
  0x28   :  { %p688_p2 = scmp.ne.s32.totalorder %s1040_s5, %s687_s10  ;;  %p691_p3 = scmp.lt.u32.totalorder %s687_s10, %s1040_s5 }
  0x2a   :  { %p693_p4 = pnand %p691_p3, %p688_p2 }
  0x2c   :  { %696 = shalt.err (!%p693_p4)
}
  0x2d   :  { %s697_s3 = scalar_lea.vmem %s79_s28, 1024  ;;  %p702_p6 = scmp.lt.s32.totalorder %s79_s28, %s79_s28 }
  0x2e   :  { %p698_p5 = scmp.ne.s32.totalorder %s79_s28, %s697_s3  ;;  %p703_p7 = scmp.lt.s32.totalorder %s697_s3, %s697_s3 }
  0x30   :  { %p704_p8 = por %p703_p7, %p702_p6 }
  0x32   :  { %p705_p9 = pnand %p704_p8, %p698_p5 }
  0x34   :  { %708 = shalt.err (!%p705_p9)
}
  0x35   :  { %84 = dma.hbm_to_vmem [thread:$0]  %s1040_s5, 1024, %s79_s28, [#allocation12], %s831_s13, %s831_s13, %s832_s14  }
  0x36   :  { %s709_s20 = scalar_lea.hbm %s1035_s0, 128 }
  0x37   :  { %p710_p10 = scmp.ne.s32.totalorder %s1035_s0, %s709_s20  ;;  %p713_p11 = scmp.lt.u32.totalorder %s709_s20, %s1035_s0 }
  0x39   :  { %p715_p12 = pnand %p713_p11, %p710_p10 }
  0x3b   :  { %718 = shalt.err (!%p715_p12)
}
  0x3c   :  { %s719_s1 = scalar_lea.vmem %s920_s30, 128  ;;  %p724_p0 = scmp.lt.s32.totalorder %s920_s30, %s920_s30 }
  0x3d   :  { %p720_p13 = scmp.ne.s32.totalorder %s920_s30, %s719_s1  ;;  %p725_p1 = scmp.lt.s32.totalorder %s719_s1, %s719_s1 }
  0x3f   :  { %p726_p2 = por %p725_p1, %p724_p0 }
  0x41   :  { %p727_p3 = pnand %p726_p2, %p720_p13 }
  0x43   :  { %730 = shalt.err (!%p727_p3)
}
  0x44   :  { %28 = dma.hbm_to_vmem [thread:$0]  %s1035_s0, 128, %s920_s30, [#allocation3], %s831_s13, %s831_s13, %s832_s14  }
  0x45   :  { %s835_s26 = smov [#allocation7]   ;;  %s836_s29 = smov [#allocation10]  }
  0x46   :  { %s47_s28 = sshll.u32 %s835_s26, 4  ;;  %s69_s8 = sshll.u32 %s836_s29, 4  ;;  %s48_s28 = int_to_ptr.vmem [resolvable:$true] %s47_s28  ;;  %s70_s8 = int_to_ptr.vmem [resolvable:$true] %s69_s8 }
  0x47   :  { %s731_s11 = scalar_lea.hbm %s1037_s2, 16 }
  0x48   :  { %p732_p4 = scmp.ne.s32.totalorder %s1037_s2, %s731_s11  ;;  %p735_p5 = scmp.lt.u32.totalorder %s731_s11, %s1037_s2 }
  0x4a   :  { %p737_p6 = pnand %p735_p5, %p732_p4 }
  0x4c   :  { %740 = shalt.err (!%p737_p6)
}
  0x4d   :  { %s741_s0 = scalar_lea.vmem %s48_s28, 16  ;;  %s745_s13 = scalar_lea.vmem %s48_s28, 32 }
  0x4e   :  { %p742_p7 = scmp.ne.s32.totalorder %s48_s28, %s741_s0  ;;  %p746_p8 = scmp.lt.s32.totalorder %s48_s28, %s48_s28 }
  0x4f   :  { %p747_p9 = scmp.lt.s32.totalorder %s745_s13, %s741_s0 }
  0x51   :  { %p748_p10 = por %p747_p9, %p746_p8 }
  0x53   :  { %p749_p11 = pnand %p748_p10, %p742_p7 }
  0x55   :  { %752 = shalt.err (!%p749_p11)
}
  0x56   :  { %50 = dma.hbm_to_vmem [thread:$0]  %s1037_s2, 16, %s48_s28, [#allocation6]  }
  0x57   :  { %s753_s18 = scalar_lea.hbm %s1039_s4, 16 }
  0x58   :  { %p754_p12 = scmp.ne.s32.totalorder %s1039_s4, %s753_s18  ;;  %p757_p13 = scmp.lt.u32.totalorder %s753_s18, %s1039_s4 }
  0x5a   :  { %p759_p0 = pnand %p757_p13, %p754_p12 }
  0x5c   :  { %762 = shalt.err (!%p759_p0)
}
  0x5d   :  { %s763_s23 = scalar_lea.vmem %s70_s8, 16  ;;  %s767_s24 = scalar_lea.vmem %s70_s8, 32 }
  0x5e   :  { %p764_p1 = scmp.ne.s32.totalorder %s70_s8, %s763_s23  ;;  %p768_p2 = scmp.lt.s32.totalorder %s70_s8, %s70_s8 }
  0x5f   :  { %p769_p3 = scmp.lt.s32.totalorder %s767_s24, %s763_s23 }
  0x61   :  { %p770_p4 = por %p769_p3, %p768_p2 }
  0x63   :  { %p771_p5 = pnand %p770_p4, %p764_p1 }
  0x65   :  { %774 = shalt.err (!%p771_p5)
}
  0x66   :  { %72 = dma.hbm_to_vmem [thread:$0]  %s1039_s4, 16, %s70_s8, [#allocation9]  }
  0x67   :  { %s837_s5 = smov [#allocation13]   ;;  %s775_s29 = scalar_lea.hbm %s1041_s6, 16 }
  0x68   :  { %s91_s25 = sshll.u32 %s837_s5, 4  ;;  %p776_p6 = scmp.ne.s32.totalorder %s1041_s6, %s775_s29  ;;  %s92_s25 = int_to_ptr.vmem [resolvable:$true] %s91_s25 }
  0x69   :  { %p779_p7 = scmp.lt.u32.totalorder %s775_s29, %s1041_s6 }
  0x6b   :  { %p781_p8 = pnand %p779_p7, %p776_p6 }
  0x6d   :  { %784 = shalt.err (!%p781_p8)
}
  0x6e   :  { %s785_s15 = scalar_lea.vmem %s92_s25, 16  ;;  %s789_s4 = scalar_lea.vmem %s92_s25, 32 }
  0x6f   :  { %p786_p9 = scmp.ne.s32.totalorder %s92_s25, %s785_s15  ;;  %p790_p10 = scmp.lt.s32.totalorder %s92_s25, %s92_s25 }
  0x70   :  { %p791_p11 = scmp.lt.s32.totalorder %s789_s4, %s785_s15 }
  0x72   :  { %p792_p12 = por %p791_p11, %p790_p10 }
  0x74   :  { %p793_p13 = pnand %p792_p12, %p786_p9 }
  0x76   :  { %796 = shalt.err (!%p793_p13)
}
  0x77   :  { %94 = dma.hbm_to_vmem [thread:$0]  %s1041_s6, 16, %s92_s25, [#allocation12]  }
  0x78   :  { %819 = dma.done.wait [#allocation3], 128  }
  0x79   :  { %820 = vsyncadd [#allocation3], 4294967168 }
  0x7a   :  { %821 = dma.done.wait [#allocation6], 1040  }
  0x7b   :  { %822 = vsyncadd [#allocation6], 4294966256 }
  0x7c   :  { %823 = dma.done.wait [#allocation9], 1040  }
  0x7d   :  { %824 = vsyncadd [#allocation9], 4294966256 }
  0x7e   :  { %825 = dma.done.wait [#allocation12], 1040  }
  0x7f   :  { %826 = vsyncadd [#allocation12], 4294966256  ;;  %v838_v0 = vmov 0.0   ;;  %vm839_vm0 = vmmov 0   ;;  %v618_v1 = vld [vmem:[#allocation5] sm:$0xff]   ;;  %v619_v2 = vld [vmem:[#allocation5 + $0x8] sm:$0xff]  }
  0x80   :  { %544 = vmatprep.subr.bf16.mxu0 %v838_v0  ;;  %560 = vmatprep.mubr.msk.bf16.mxu0 %vm839_vm0, %v838_v0  ;;  %v620_v3 = vld [vmem:[#allocation5 + $0x10] sm:$0xff]   ;;  %v627_v4 = vld [vmem:[#allocation8] sm:$0xff]   ;;  %v621_v5 = vld [vmem:[#allocation5 + $0x18] sm:$0xff]   ;;  %s840_s6 = smov [#allocation14]  }
  0x81   :  { %564 = vmatprep.subr.bf16.mxu1 %v838_v0  ;;  %580 = vmatprep.mubr.msk.bf16.mxu1 %vm839_vm0, %v838_v0  ;;  %v628_v6 = vld [vmem:[#allocation8 + $0x8] sm:$0xff]   ;;  %v622_v7 = vld [vmem:[#allocation5 + $0x20] sm:$0xff]   ;;  %v629_v8 = vld [vmem:[#allocation8 + $0x10] sm:$0xff]   ;;  %s474_s3 = sshll.u32 %s840_s6, 4  ;;  %s475_s3 = int_to_ptr.vmem [resolvable:$true] %s474_s3 }
  0x82   :  { %545 = vmatpush3.bf16.msra.mxu0 %v618_v1  ;;  %565 = vmatpush3.bf16.msra.mxu1 %v627_v4  ;;  %v623_v9 = vld [vmem:[#allocation5 + $0x28] sm:$0xff]   ;;  %v630_v10 = vld [vmem:[#allocation8 + $0x18] sm:$0xff]   ;;  %v624_v11 = vld [vmem:[#allocation5 + $0x30] sm:$0xff]   ;;  %s797_s0 = scalar_lea.vmem %s475_s3, 256  ;;  %p802_p1 = scmp.lt.s32.totalorder %s475_s3, %s475_s3 }
  0x83   :  { %546 = vmatprep.subr.bf16.mxu0 %v838_v0  ;;  %566 = vmatprep.subr.bf16.mxu1 %v838_v0  ;;  %v631_v12 = vld [vmem:[#allocation8 + $0x20] sm:$0xff]   ;;  %v625_v13 = vld [vmem:[#allocation5 + $0x38] sm:$0xff]   ;;  %v632_v14 = vld [vmem:[#allocation8 + $0x28] sm:$0xff]   ;;  %p798_p0 = scmp.ne.s32.totalorder %s475_s3, %s797_s0  ;;  %p803_p2 = scmp.lt.s32.totalorder %s797_s0, %s797_s0 }
  0x84   :  { %v626_v15 = vld [vmem:[#allocation2] sm:$0xff]   ;;  %v635_v18 = vld [vmem:[#allocation11] sm:$0xff]   ;;  %v636_v19 = vld [vmem:[#allocation11 + $0x8] sm:$0xff]  }
  0x85   :  { %v633_v16 = vld [vmem:[#allocation8 + $0x30] sm:$0xff]   ;;  %v634_v17 = vld [vmem:[#allocation8 + $0x38] sm:$0xff]   ;;  %v639_v22 = vld [vmem:[#allocation11 + $0x20] sm:$0xff]   ;;  %p804_p3 = por %p803_p2, %p802_p1 }
  0x86   :  { %547 = vmatpush3.bf16.msra.mxu0 %v619_v2  ;;  %567 = vmatpush3.bf16.msra.mxu1 %v628_v6  ;;  %v637_v20 = vld [vmem:[#allocation11 + $0x10] sm:$0xff]   ;;  %v638_v21 = vld [vmem:[#allocation11 + $0x18] sm:$0xff]   ;;  %v640_v23 = vld [vmem:[#allocation11 + $0x28] sm:$0xff]  }
  0x87   :  { %548 = vmatprep.subr.bf16.mxu0 %v838_v0  ;;  %568 = vmatprep.subr.bf16.mxu1 %v838_v0  ;;  %v489_v24 = vld [vmem:[#allocation7] ss:$0 sm:$0xff]  ;;  %v641_v34 = vld [vmem:[#allocation11 + $0x30] sm:$0xff]   ;;  %v499_v36 = vld [vmem:[#allocation10] ss:$0 sm:$0xff]  ;;  %p805_p4 = pnand %p804_p3, %p798_p0 }
  0x88   :  { %v642_v35 = vld [vmem:[#allocation11 + $0x38] sm:$0xff]   ;;  %v508_v46 = vld [vmem:[#allocation13] ss:$0 sm:$0xff] }
  0x8a   :  { %549 = vmatpush3.bf16.msra.mxu0 %v620_v3  ;;  %569 = vmatpush3.bf16.msra.mxu1 %v629_v8 }
  0x8b   :  { %550 = vmatprep.subr.bf16.mxu0 %v838_v0  ;;  %570 = vmatprep.subr.bf16.mxu1 %v838_v0 }
  0x8e   :  { %551 = vmatpush3.bf16.msra.mxu0 %v621_v5  ;;  %571 = vmatpush3.bf16.msra.mxu1 %v630_v10 }
  0x8f   :  { %552 = vmatprep.subr.bf16.mxu0 %v838_v0  ;;  %572 = vmatprep.subr.bf16.mxu1 %v838_v0 }
  0x92   :  { %553 = vmatpush3.bf16.msra.mxu0 %v622_v7  ;;  %573 = vmatpush3.bf16.msra.mxu1 %v631_v12 }
  0x93   :  { %554 = vmatprep.subr.bf16.mxu0 %v838_v0  ;;  %574 = vmatprep.subr.bf16.mxu1 %v838_v0 }
  0x96   :  { %555 = vmatpush3.bf16.msra.mxu0 %v623_v9  ;;  %575 = vmatpush3.bf16.msra.mxu1 %v632_v14 }
  0x97   :  { %556 = vmatprep.subr.bf16.mxu0 %v838_v0  ;;  %576 = vmatprep.subr.bf16.mxu1 %v838_v0 }
  0x9a   :  { %557 = vmatpush3.bf16.msra.mxu0 %v624_v11  ;;  %577 = vmatpush3.bf16.msra.mxu1 %v633_v16 }
  0x9b   :  { %558 = vmatprep.subr.bf16.mxu0 %v838_v0  ;;  %578 = vmatprep.subr.bf16.mxu1 %v838_v0 }
  0x9e   :  { %559 = vmatpush3.bf16.msra.mxu0 %v625_v13  ;;  %579 = vmatpush3.bf16.msra.mxu1 %v634_v17 }
  0x9f   :  { %584 = vmatprep.subr.bf16.mxu0 %v838_v0 }
  0xa1   :  { %561 = vmatmul.mubr.bf16.vlgmr.msra.gmra.mrb[0].mxu0 %v626_v15 }
  0xa2   :  { %600 = vmatprep.mubr.msk.bf16.mxu0 %vm839_vm0, %v838_v0  ;;  %585 = vmatpush3.bf16.msra.mxu0 %v635_v18 }
  0xa3   :  { %586 = vmatprep.subr.bf16.mxu0 %v838_v0 }
  0xa6   :  { %587 = vmatpush3.bf16.msra.mxu0 %v636_v19 }
  0xa7   :  { %588 = vmatprep.subr.bf16.mxu0 %v838_v0 }
  0xaa   :  { %589 = vmatpush3.bf16.msra.mxu0 %v637_v20 }
  0xab   :  { %590 = vmatprep.subr.bf16.mxu0 %v838_v0 }
  0xae   :  { %591 = vmatpush3.bf16.msra.mxu0 %v638_v21 }
  0xaf   :  { %592 = vmatprep.subr.bf16.mxu0 %v838_v0 }
  0xb2   :  { %593 = vmatpush3.bf16.msra.mxu0 %v639_v22 }
  0xb3   :  { %594 = vmatprep.subr.bf16.mxu0 %v838_v0 }
  0xb6   :  { %595 = vmatpush3.bf16.msra.mxu0 %v640_v23 }
  0xb7   :  { %596 = vmatprep.subr.bf16.mxu0 %v838_v0 }
  0xba   :  { %597 = vmatpush3.bf16.msra.mxu0 %v641_v34 }
  0xbb   :  { %598 = vmatprep.subr.bf16.mxu0 %v838_v0 }
  0xbe   :  { %599 = vmatpush3.bf16.msra.mxu0 %v642_v35 }
 0x174   :  { %v230_v25 = vpop.f32.mrb[0].mxu0 }
 0x175   :  { %v231_v26 = vadd.f32 %v489_v24, %v230_v25  ;;  %v562_v27 = vpop.f32.mrb[1].mxu0 }
 0x176   :  { %v233_v28 = vpop.f32.mrb[2].mxu0 }
 0x177   :  { %v234_v29 = vadd.f32 %v489_v24, %v233_v28  ;;  %v563_v30 = vpop.f32.mrb[3].mxu0  ;;  %v237_v31 = vmax.f32 %v231_v26, 0.0 }
 0x179   :  { %v238_v32 = vmax.f32 %v234_v29, 0.0 }
 0x17b   :  { %v239_v33 = vpack.c.bf16 %v238_v32, %v237_v31 }
 0x17d   :  { %581 = vmatmul.mubr.bf16.vlgmr.msra.gmra.mrb[0].mxu1 %v239_v33 }
 0x250   :  { %v345_v37 = vpop.f32.mrb[0].mxu1 }
 0x251   :  { %v346_v38 = vadd.f32 %v499_v36, %v345_v37  ;;  %v582_v39 = vpop.f32.mrb[1].mxu1 }
 0x252   :  { %v348_v40 = vpop.f32.mrb[2].mxu1 }
 0x253   :  { %v349_v41 = vadd.f32 %v499_v36, %v348_v40  ;;  %v583_v42 = vpop.f32.mrb[3].mxu1  ;;  %v352_v43 = vmax.f32 %v346_v38, 0.0 }
 0x255   :  { %v353_v44 = vmax.f32 %v349_v41, 0.0 }
 0x257   :  { %v354_v45 = vpack.c.bf16 %v353_v44, %v352_v43 }
 0x259   :  { %601 = vmatmul.mubr.bf16.vlgmr.msra.gmra.mrb[4].mxu0 %v354_v45 }
 0x32c   :  { %v460_v47 = vpop.f32.mrb[4].mxu0 }
 0x32d   :  { %v461_v48 = vadd.f32 %v508_v46, %v460_v47  ;;  %v602_v49 = vpop.f32.mrb[5].mxu0 }
 0x32e   :  { %v463_v50 = vpop.f32.mrb[6].mxu0 }
 0x32f   :  { %467 = vst [vmem:[#allocation14] sm:$0xff] %v461_v48  ;;  %v464_v51 = vadd.f32 %v508_v46, %v463_v50  ;;  %v603_v52 = vpop.f32.mrb[7].mxu0 }
 0x331   :  { %468 = vst [vmem:[#allocation14 + $0x8] sm:$0xff] %v464_v51 }
 0x332   :  { %808 = shalt.err (!%p805_p4)
}
 0x333   :  { %s809_s30 = scalar_lea.hbm %s1042_s7, 256 }
 0x334   :  { %p810_p5 = scmp.ne.s32.totalorder %s1042_s7, %s809_s30  ;;  %p813_p6 = scmp.lt.u32.totalorder %s809_s30, %s1042_s7 }
 0x336   :  { %p815_p7 = pnand %p813_p6, %p810_p5 }
 0x338   :  { %818 = shalt.err (!%p815_p7)
}
 0x339   :  { %s841_s20 = smov 128   ;;  %s842_s21 = smov 8  }
 0x33a   :  { %480 = dma.vmem_to_hbm [thread:$0]  %s475_s3, 256, %s1042_s7, [#allocation4], %s841_s20, %s841_s20, %s842_s21  }
 0x33b   :  { %827 = dma.done.wait [#allocation4], 256  }
 0x33c   :  { %828 = vsyncadd [#allocation4], 4294967040 }
 0x33d   :  { %484 = vsyncpa [#allocation3], 1 }
 0x33e   :  { %485 = vsyncpa [#allocation6], 1 }
 0x33f   :  { %486 = vsyncpa [#allocation9], 1 }
 0x340   :  { %487 = vsyncpa [#allocation12], 1 }
 0x341   :  { %488 = vsyncpa [#allocation4], 1 }

// kernel: _forward_impl.2
= control target key start
LH: loop header
LB: loop body
LE: loop exit
PB: predicated region body
PF: predicated region fallthrough
CT: control target
= control target key end

     0   :  { %8 = vsyncpa [#allocation4], 0  ;;  %s1745_s0 = inlined_call_operand.hbm [shape: bf16[16,1536], index: 0, kind: input, shape index: {}]   ;;  %s1746_s1 = inlined_call_operand.hbm [shape: bf16[1536,128], index: 1, kind: input, shape index: {}]   ;;  %s1747_s2 = inlined_call_operand.hbm [shape: f32[1,128], index: 2, kind: input, shape index: {}]   ;;  %s1748_s3 = inlined_call_operand.hbm [shape: bf16[16,128], index: 3, kind: output, shape index: {}]  }
   0x1   :  { %9 = vsyncpa [#allocation7], 0 }
   0x2   :  { %10 = vsyncpa [#allocation5], 0  ;;  %s1663_s12 = smov [#allocation6]   ;;  %s1569_s16 = scalar_lea.hbm %s1746_s1, 12288 }
   0x3   :  { %s28_s13 = sshll.u32 %s1663_s12, 4  ;;  %p1570_p0 = scmp.ne.s32.totalorder %s1746_s1, %s1569_s16  ;;  %s29_s13 = int_to_ptr.vmem [resolvable:$true] %s28_s13 }
   0x4   :  { %p1573_p1 = scmp.lt.u32.totalorder %s1569_s16, %s1746_s1 }
   0x6   :  { %p1575_p2 = pnand %p1573_p1, %p1570_p0 }
   0x8   :  { %1578 = shalt.err (!%p1575_p2)
}
   0x9   :  { %s1579_s21 = scalar_lea.vmem %s29_s13, 12288  ;;  %p1584_p4 = scmp.lt.s32.totalorder %s29_s13, %s29_s13 }
   0xa   :  { %p1580_p3 = scmp.ne.s32.totalorder %s29_s13, %s1579_s21  ;;  %p1585_p5 = scmp.lt.s32.totalorder %s1579_s21, %s1579_s21 }
   0xc   :  { %p1586_p6 = por %p1585_p5, %p1584_p4 }
   0xe   :  { %p1587_p7 = pnand %p1586_p6, %p1580_p3 }
  0x10   :  { %1590 = shalt.err (!%p1587_p7)
}
  0x11   :  { %s1664_s22 = smov 64   ;;  %s1665_s23 = smov 4  }
  0x12   :  { %34 = dma.hbm_to_vmem [thread:$0]  %s1746_s1, 12288, %s29_s13, [#allocation7], %s1664_s22, %s1664_s22, %s1665_s23  }
  0x13   :  { %s1666_s26 = smov [#allocation3]   ;;  %s1591_s30 = scalar_lea.hbm %s1745_s0, 1536 }
  0x14   :  { %s16_s27 = sshll.u32 %s1666_s26, 4  ;;  %p1592_p8 = scmp.ne.s32.totalorder %s1745_s0, %s1591_s30  ;;  %s17_s27 = int_to_ptr.vmem [resolvable:$true] %s16_s27 }
  0x15   :  { %p1595_p9 = scmp.lt.u32.totalorder %s1591_s30, %s1745_s0 }
  0x17   :  { %p1597_p10 = pnand %p1595_p9, %p1592_p8 }
  0x19   :  { %1600 = shalt.err (!%p1597_p10)
}
  0x1a   :  { %s1601_s8 = scalar_lea.vmem %s17_s27, 1536  ;;  %p1606_p12 = scmp.lt.s32.totalorder %s17_s27, %s17_s27 }
  0x1b   :  { %p1602_p11 = scmp.ne.s32.totalorder %s17_s27, %s1601_s8  ;;  %p1607_p13 = scmp.lt.s32.totalorder %s1601_s8, %s1601_s8 }
  0x1d   :  { %p1608_p0 = por %p1607_p13, %p1606_p12 }
  0x1f   :  { %p1609_p1 = pnand %p1608_p0, %p1602_p11 }
  0x21   :  { %1612 = shalt.err (!%p1609_p1)
}
  0x22   :  { %s1667_s1 = smov 768   ;;  %s1668_s9 = smov 48  }
  0x23   :  { %22 = dma.hbm_to_vmem [thread:$0]  %s1745_s0, 1536, %s17_s27, [#allocation4], %s1667_s1, %s1667_s1, %s1668_s9  }
  0x24   :  { %s1669_s12 = smov [#allocation8]   ;;  %s1613_s16 = scalar_lea.hbm %s1747_s2, 16 }
  0x25   :  { %s41_s13 = sshll.u32 %s1669_s12, 4  ;;  %p1614_p2 = scmp.ne.s32.totalorder %s1747_s2, %s1613_s16  ;;  %s42_s13 = int_to_ptr.vmem [resolvable:$true] %s41_s13 }
  0x26   :  { %p1617_p3 = scmp.lt.u32.totalorder %s1613_s16, %s1747_s2 }
  0x28   :  { %p1619_p4 = pnand %p1617_p3, %p1614_p2 }
  0x2a   :  { %1622 = shalt.err (!%p1619_p4)
}
  0x2b   :  { %s1623_s21 = scalar_lea.vmem %s42_s13, 16  ;;  %s1627_s0 = scalar_lea.vmem %s42_s13, 32 }
  0x2c   :  { %p1624_p5 = scmp.ne.s32.totalorder %s42_s13, %s1623_s21  ;;  %p1628_p6 = scmp.lt.s32.totalorder %s42_s13, %s42_s13 }
  0x2d   :  { %p1629_p7 = scmp.lt.s32.totalorder %s1627_s0, %s1623_s21 }
  0x2f   :  { %p1630_p8 = por %p1629_p7, %p1628_p6 }
  0x31   :  { %p1631_p9 = pnand %p1630_p8, %p1624_p5 }
  0x33   :  { %1634 = shalt.err (!%p1631_p9)
}
  0x34   :  { %44 = dma.hbm_to_vmem [thread:$0]  %s1747_s2, 16, %s42_s13, [#allocation7]  }
  0x35   :  { %1657 = dma.done.wait [#allocation4], 1536  }
  0x36   :  { %1658 = vsyncadd [#allocation4], 4294965760 }
  0x37   :  { %1659 = dma.done.wait [#allocation7], 12304  }
  0x38   :  { %1660 = vsyncadd [#allocation7], 4294954992  ;;  %v1455_v0 = vld [vmem:[#allocation6 + $0x40] sm:$0xff]   ;;  %v1459_v4 = vld [vmem:[#allocation6 + $0x48] sm:$0xff]   ;;  %s1670_s2 = smov [#allocation9]  }
  0x39   :  { %v1456_v1 = vld [vmem:[#allocation6 + $0xc0] sm:$0xff]   ;;  %1315 = vmatprep.subr.bf16.mxu0 %v1455_v0  ;;  %v1460_v5 = vld [vmem:[#allocation6 + $0xc8] sm:$0xff]   ;;  %v1463_v8 = vld [vmem:[#allocation6 + $0x50] sm:$0xff]   ;;  %s1184_s26 = sshll.u32 %s1670_s2, 4  ;;  %s1185_s26 = int_to_ptr.vmem [resolvable:$true] %s1184_s26 }
  0x3a   :  { %v1457_v2 = vld [vmem:[#allocation6] sm:$0xff]   ;;  %1337 = vmatprep.subr.bf16.mxu1 %v1456_v1  ;;  %v1461_v6 = vld [vmem:[#allocation6 + $0x8] sm:$0xff]   ;;  %v1464_v9 = vld [vmem:[#allocation6 + $0xd0] sm:$0xff]   ;;  %s1635_s27 = scalar_lea.vmem %s1185_s26, 128  ;;  %p1640_p11 = scmp.lt.s32.totalorder %s1185_s26, %s1185_s26 }
  0x3b   :  { %v1458_v3 = vld [vmem:[#allocation6 + $0x80] sm:$0xff]   ;;  %1316 = vmatpush3.bf16.msra.mxu0 %v1457_v2  ;;  %v1462_v7 = vld [vmem:[#allocation6 + $0x88] sm:$0xff]   ;;  %v1465_v10 = vld [vmem:[#allocation6 + $0x10] sm:$0xff]   ;;  %p1636_p10 = scmp.ne.s32.totalorder %s1185_s26, %s1635_s27  ;;  %p1641_p12 = scmp.lt.s32.totalorder %s1635_s27, %s1635_s27 }
  0x3c   :  { %1338 = vmatpush3.bf16.msra.mxu1 %v1458_v3  ;;  %1317 = vmatprep.subr.bf16.mxu0 %v1459_v4  ;;  %v1466_v11 = vld [vmem:[#allocation6 + $0x90] sm:$0xff]   ;;  %v1467_v12 = vld [vmem:[#allocation6 + $0x58] sm:$0xff]   ;;  %v1471_v16 = vld [vmem:[#allocation6 + $0x60] sm:$0xff]  }
  0x3d   :  { %1339 = vmatprep.subr.bf16.mxu1 %v1460_v5  ;;  %v1468_v13 = vld [vmem:[#allocation6 + $0xd8] sm:$0xff]   ;;  %v1472_v17 = vld [vmem:[#allocation6 + $0xe0] sm:$0xff]   ;;  %v1475_v20 = vld [vmem:[#allocation6 + $0x68] sm:$0xff]   ;;  %p1642_p13 = por %p1641_p12, %p1640_p11 }
  0x3e   :  { %v1469_v14 = vld [vmem:[#allocation6 + $0x18] sm:$0xff]   ;;  %v1473_v18 = vld [vmem:[#allocation6 + $0x20] sm:$0xff]   ;;  %v1476_v21 = vld [vmem:[#allocation6 + $0xe8] sm:$0xff]  }
  0x3f   :  { %1318 = vmatpush3.bf16.msra.mxu0 %v1461_v6  ;;  %v1470_v15 = vld [vmem:[#allocation6 + $0x98] sm:$0xff]   ;;  %v1474_v19 = vld [vmem:[#allocation6 + $0xa0] sm:$0xff]   ;;  %v1477_v22 = vld [vmem:[#allocation6 + $0x28] sm:$0xff]   ;;  %p1643_p0 = pnand %p1642_p13, %p1636_p10 }
  0x40   :  { %1340 = vmatpush3.bf16.msra.mxu1 %v1462_v7  ;;  %1319 = vmatprep.subr.bf16.mxu0 %v1463_v8  ;;  %v1478_v23 = vld [vmem:[#allocation6 + $0xa8] sm:$0xff]   ;;  %v1479_v24 = vld [vmem:[#allocation6 + $0x70] sm:$0xff]   ;;  %v1483_v28 = vld [vmem:[#allocation6 + $0x78] sm:$0xff]  }
  0x41   :  { %1341 = vmatprep.subr.bf16.mxu1 %v1464_v9  ;;  %v1480_v25 = vld [vmem:[#allocation6 + $0xf0] sm:$0xff]   ;;  %v1484_v29 = vld [vmem:[#allocation6 + $0xf8] sm:$0xff]   ;;  %v1493_v36 = vld [vmem:[#allocation6 + $0x140] sm:$0xff]  }
  0x42   :  { %v1481_v26 = vld [vmem:[#allocation6 + $0x30] sm:$0xff]   ;;  %v1485_v30 = vld [vmem:[#allocation6 + $0x38] sm:$0xff]   ;;  %v1494_v37 = vld [vmem:[#allocation6 + $0x1c0] sm:$0xff]  }
  0x43   :  { %1320 = vmatpush3.bf16.msra.mxu0 %v1465_v10  ;;  %v1482_v27 = vld [vmem:[#allocation6 + $0xb0] sm:$0xff]   ;;  %v1486_v31 = vld [vmem:[#allocation6 + $0xb8] sm:$0xff]   ;;  %v1495_v38 = vld [vmem:[#allocation6 + $0x100] sm:$0xff]  }
  0x44   :  { %1342 = vmatpush3.bf16.msra.mxu1 %v1466_v11  ;;  %1321 = vmatprep.subr.bf16.mxu0 %v1467_v12  ;;  %v1487_v32 = vld [vmem:[#allocation3] ss:$48 sps:$4 sm:$0xff]   ;;  %v1489_v33 = vld [vmem:[#allocation3 + $0x4] ss:$48 sps:$4 sm:$0xff]   ;;  %v1490_v34 = vld [vmem:[#allocation3 + $0x8] ss:$48 sps:$4 sm:$0xff]  }
  0x45   :  { %1343 = vmatprep.subr.bf16.mxu1 %v1468_v13  ;;  %v1492_v35 = vld [vmem:[#allocation3 + $0xc] ss:$48 sps:$4 sm:$0xff]   ;;  %935 = vmatprep.mubr.bf16.mxu0 %v1489_v33  ;;  %v1496_v39 = vld [vmem:[#allocation6 + $0x180] sm:$0xff]   ;;  %v1501_v44 = vld [vmem:[#allocation6 + $0x150] sm:$0xff]  }
  0x46   :  { %976 = vmatprep.mubr.bf16.mxu1 %v1492_v35  ;;  %v1497_v40 = vld [vmem:[#allocation6 + $0x148] sm:$0xff]   ;;  %v1502_v45 = vld [vmem:[#allocation6 + $0x1d0] sm:$0xff]   ;;  %v1505_v48 = vld [vmem:[#allocation6 + $0x158] sm:$0xff]  }
  0x47   :  { %1322 = vmatpush3.bf16.msra.mxu0 %v1469_v14  ;;  %v1498_v41 = vld [vmem:[#allocation6 + $0x1c8] sm:$0xff]   ;;  %v1503_v46 = vld [vmem:[#allocation6 + $0x110] sm:$0xff]   ;;  %v1506_v49 = vld [vmem:[#allocation6 + $0x1d8] sm:$0xff]  }
  0x48   :  { %1344 = vmatpush3.bf16.msra.mxu1 %v1470_v15  ;;  %1323 = vmatprep.subr.bf16.mxu0 %v1471_v16  ;;  %v1499_v42 = vld [vmem:[#allocation6 + $0x108] sm:$0xff]   ;;  %v1504_v47 = vld [vmem:[#allocation6 + $0x190] sm:$0xff]   ;;  %v1507_v50 = vld [vmem:[#allocation6 + $0x118] sm:$0xff]  }
  0x49   :  { %1345 = vmatprep.subr.bf16.mxu1 %v1472_v17  ;;  %v1500_v43 = vld [vmem:[#allocation6 + $0x188] sm:$0xff]   ;;  %v1508_v51 = vld [vmem:[#allocation6 + $0x198] sm:$0xff]   ;;  %v1509_v52 = vld [vmem:[#allocation6 + $0x160] sm:$0xff]  }
  0x4a   :  { %v1510_v53 = vld [vmem:[#allocation6 + $0x1e0] sm:$0xff]   ;;  %v1513_v56 = vld [vmem:[#allocation6 + $0x168] sm:$0xff]   ;;  %v1517_v60 = vld [vmem:[#allocation6 + $0x170] sm:$0xff]  }
  0x4b   :  { %1324 = vmatpush3.bf16.msra.mxu0 %v1473_v18  ;;  %v1511_v54 = vld [vmem:[#allocation6 + $0x120] sm:$0xff]   ;;  %v1514_v57 = vld [vmem:[#allocation6 + $0x1e8] sm:$0xff]   ;;  %v1518_v61 = vld [vmem:[#allocation6 + $0x1f0] sm:$0xff]  }
  0x4c   :  { %1346 = vmatpush3.bf16.msra.mxu1 %v1474_v19  ;;  %1325 = vmatprep.subr.bf16.mxu0 %v1475_v20  ;;  %v1512_v55 = vld [vmem:[#allocation6 + $0x1a0] sm:$0xff]   ;;  %v1515_v58 = vld [vmem:[#allocation6 + $0x128] sm:$0xff]   ;;  %v1519_v62 = vld [vmem:[#allocation6 + $0x130] sm:$0xff]  }
  0x4d   :  { %1347 = vmatprep.subr.bf16.mxu1 %v1476_v21  ;;  %v1516_v59 = vld [vmem:[#allocation6 + $0x1a8] sm:$0xff]   ;;  %v1520_v63 = vld [vmem:[#allocation6 + $0x1b0] sm:$0xff]   ;;  %v1521_v0 = vld [vmem:[#allocation6 + $0x178] sm:$0xff]  }
  0x4e   :  { %v1522_v1 = vld [vmem:[#allocation6 + $0x1f8] sm:$0xff]   ;;  %v1525_v4 = vld [vmem:[#allocation3 + $0x10] ss:$48 sps:$4 sm:$0xff]   ;;  %v1527_v5 = vld [vmem:[#allocation3 + $0x14] ss:$48 sps:$4 sm:$0xff]  }
  0x4f   :  { %1326 = vmatpush3.bf16.msra.mxu0 %v1477_v22  ;;  %v1523_v2 = vld [vmem:[#allocation6 + $0x138] sm:$0xff]   ;;  %v1531_v8 = vld [vmem:[#allocation6 + $0x240] sm:$0xff]   ;;  %v1535_v12 = vld [vmem:[#allocation6 + $0x248] sm:$0xff]  }
  0x50   :  { %1348 = vmatpush3.bf16.msra.mxu1 %v1478_v23  ;;  %1327 = vmatprep.subr.bf16.mxu0 %v1479_v24  ;;  %v1524_v3 = vld [vmem:[#allocation6 + $0x1b8] sm:$0xff]   ;;  %v1532_v9 = vld [vmem:[#allocation6 + $0x2c0] sm:$0xff]   ;;  %v1536_v13 = vld [vmem:[#allocation6 + $0x2c8] sm:$0xff]  }
  0x51   :  { %1349 = vmatprep.subr.bf16.mxu1 %v1480_v25  ;;  %v1528_v6 = vld [vmem:[#allocation3 + $0x18] ss:$48 sps:$4 sm:$0xff]   ;;  %v1530_v7 = vld [vmem:[#allocation3 + $0x1c] ss:$48 sps:$4 sm:$0xff]   ;;  %v1533_v10 = vld [vmem:[#allocation6 + $0x200] sm:$0xff]  }
  0x52   :  { %v1534_v11 = vld [vmem:[#allocation6 + $0x280] sm:$0xff]   ;;  %v1537_v14 = vld [vmem:[#allocation6 + $0x208] sm:$0xff]   ;;  %v1539_v16 = vld [vmem:[#allocation6 + $0x250] sm:$0xff]  }
  0x53   :  { %1328 = vmatpush3.bf16.msra.mxu0 %v1481_v26  ;;  %v1538_v15 = vld [vmem:[#allocation6 + $0x288] sm:$0xff]   ;;  %v1540_v17 = vld [vmem:[#allocation6 + $0x2d0] sm:$0xff]   ;;  %v1543_v20 = vld [vmem:[#allocation6 + $0x258] sm:$0xff]  }
  0x54   :  { %1350 = vmatpush3.bf16.msra.mxu1 %v1482_v27  ;;  %1329 = vmatprep.subr.bf16.mxu0 %v1483_v28  ;;  %v1541_v18 = vld [vmem:[#allocation6 + $0x210] sm:$0xff]   ;;  %v1544_v21 = vld [vmem:[#allocation6 + $0x2d8] sm:$0xff]   ;;  %v1547_v24 = vld [vmem:[#allocation6 + $0x260] sm:$0xff]  }
  0x55   :  { %1351 = vmatprep.subr.bf16.mxu1 %v1484_v29  ;;  %v1542_v19 = vld [vmem:[#allocation6 + $0x290] sm:$0xff]   ;;  %v1545_v22 = vld [vmem:[#allocation6 + $0x218] sm:$0xff]   ;;  %v1548_v25 = vld [vmem:[#allocation6 + $0x2e0] sm:$0xff]  }
  0x56   :  { %v1546_v23 = vld [vmem:[#allocation6 + $0x298] sm:$0xff]   ;;  %v1549_v26 = vld [vmem:[#allocation6 + $0x220] sm:$0xff]   ;;  %v1551_v28 = vld [vmem:[#allocation6 + $0x268] sm:$0xff]  }
  0x57   :  { %1330 = vmatpush3.bf16.msra.mxu0 %v1485_v30  ;;  %v1550_v27 = vld [vmem:[#allocation6 + $0x2a0] sm:$0xff]   ;;  %v1552_v29 = vld [vmem:[#allocation6 + $0x2e8] sm:$0xff]   ;;  %v1556_v33 = vld [vmem:[#allocation6 + $0x2f0] sm:$0xff]  }
  0x58   :  { %1352 = vmatpush3.bf16.msra.mxu1 %v1486_v31  ;;  %1359 = vmatprep.subr.bf16.mxu0 %v1493_v36  ;;  %v1553_v30 = vld [vmem:[#allocation6 + $0x228] sm:$0xff]   ;;  %v1558_v35 = vld [vmem:[#allocation6 + $0x2b0] sm:$0xff]   ;;  %v1559_v36 = vld [vmem:[#allocation6 + $0x278] sm:$0xff]  }
  0x59   :  { %1381 = vmatprep.subr.bf16.mxu1 %v1494_v37  ;;  %v1554_v31 = vld [vmem:[#allocation6 + $0x2a8] sm:$0xff]   ;;  %v1560_v37 = vld [vmem:[#allocation6 + $0x2f8] sm:$0xff]  }
  0x5a   :  { %936 = vmatmul.mubr.bf16.vlgmr.msra.gmra.mrb[0].mxu0 %v1487_v32  ;;  %v1555_v32 = vld [vmem:[#allocation6 + $0x270] sm:$0xff]  }
  0x5b   :  { %977 = vmatmul.mubr.bf16.vlgmr.msra.gmra.mrb[0].mxu1 %v1490_v34  ;;  %1360 = vmatpush3.bf16.msra.mxu0 %v1495_v38  ;;  %v1557_v34 = vld [vmem:[#allocation6 + $0x230] sm:$0xff]   ;;  %v1561_v38 = vld [vmem:[#allocation6 + $0x238] sm:$0xff]  }
  0x5c   :  { %1382 = vmatpush3.bf16.msra.mxu1 %v1496_v39  ;;  %1361 = vmatprep.subr.bf16.mxu0 %v1497_v40  ;;  %v1562_v39 = vld [vmem:[#allocation6 + $0x2b8] sm:$0xff]   ;;  %v1563_v40 = vld [vmem:[#allocation3 + $0x20] ss:$48 sps:$4 sm:$0xff]  }
  0x5d   :  { %1383 = vmatprep.subr.bf16.mxu1 %v1498_v41  ;;  %1017 = vmatprep.mubr.bf16.mxu0 %v1527_v5  ;;  %v1565_v41 = vld [vmem:[#allocation3 + $0x24] ss:$48 sps:$4 sm:$0xff]  }
  0x5e   :  { %1058 = vmatprep.mubr.bf16.mxu1 %v1530_v7 }
  0x5f   :  { %1362 = vmatpush3.bf16.msra.mxu0 %v1499_v42  ;;  %v1566_v42 = vld [vmem:[#allocation3 + $0x28] ss:$48 sps:$4 sm:$0xff]  }
  0x60   :  { %1384 = vmatpush3.bf16.msra.mxu1 %v1500_v43  ;;  %1363 = vmatprep.subr.bf16.mxu0 %v1501_v44  ;;  %v1568_v43 = vld [vmem:[#allocation3 + $0x2c] ss:$48 sps:$4 sm:$0xff]  }
  0x61   :  { %1385 = vmatprep.subr.bf16.mxu1 %v1502_v45 }
  0x63   :  { %1364 = vmatpush3.bf16.msra.mxu0 %v1503_v46 }
  0x64   :  { %1386 = vmatpush3.bf16.msra.mxu1 %v1504_v47  ;;  %1365 = vmatprep.subr.bf16.mxu0 %v1505_v48 }
  0x65   :  { %1387 = vmatprep.subr.bf16.mxu1 %v1506_v49 }
  0x67   :  { %1366 = vmatpush3.bf16.msra.mxu0 %v1507_v50 }
  0x68   :  { %1388 = vmatpush3.bf16.msra.mxu1 %v1508_v51  ;;  %1367 = vmatprep.subr.bf16.mxu0 %v1509_v52 }
  0x69   :  { %1389 = vmatprep.subr.bf16.mxu1 %v1510_v53 }
  0x6b   :  { %1368 = vmatpush3.bf16.msra.mxu0 %v1511_v54 }
  0x6c   :  { %1390 = vmatpush3.bf16.msra.mxu1 %v1512_v55  ;;  %1369 = vmatprep.subr.bf16.mxu0 %v1513_v56 }
  0x6d   :  { %1391 = vmatprep.subr.bf16.mxu1 %v1514_v57 }
  0x6f   :  { %1370 = vmatpush3.bf16.msra.mxu0 %v1515_v58 }
  0x70   :  { %1392 = vmatpush3.bf16.msra.mxu1 %v1516_v59  ;;  %1371 = vmatprep.subr.bf16.mxu0 %v1517_v60 }
  0x71   :  { %1393 = vmatprep.subr.bf16.mxu1 %v1518_v61 }
  0x73   :  { %1372 = vmatpush3.bf16.msra.mxu0 %v1519_v62 }
  0x74   :  { %1394 = vmatpush3.bf16.msra.mxu1 %v1520_v63  ;;  %1373 = vmatprep.subr.bf16.mxu0 %v1521_v0 }
  0x75   :  { %1395 = vmatprep.subr.bf16.mxu1 %v1522_v1 }
  0x77   :  { %1374 = vmatpush3.bf16.msra.mxu0 %v1523_v2 }
  0x78   :  { %1396 = vmatpush3.bf16.msra.mxu1 %v1524_v3  ;;  %1403 = vmatprep.subr.bf16.mxu0 %v1531_v8 }
  0x79   :  { %1425 = vmatprep.subr.bf16.mxu1 %v1532_v9 }
  0x7a   :  { %1018 = vmatmul.mubr.bf16.vlgmr.msra.gmra.mrb[4].mxu0 %v1525_v4 }
  0x7b   :  { %1059 = vmatmul.mubr.bf16.vlgmr.msra.gmra.mrb[4].mxu1 %v1528_v6  ;;  %1404 = vmatpush3.bf16.msra.mxu0 %v1533_v10 }
  0x7c   :  { %1426 = vmatpush3.bf16.msra.mxu1 %v1534_v11  ;;  %1405 = vmatprep.subr.bf16.mxu0 %v1535_v12 }
  0x7d   :  { %1427 = vmatprep.subr.bf16.mxu1 %v1536_v13  ;;  %1099 = vmatprep.mubr.bf16.mxu0 %v1565_v41 }
  0x7e   :  { %1140 = vmatprep.mubr.bf16.mxu1 %v1568_v43 }
  0x7f   :  { %1406 = vmatpush3.bf16.msra.mxu0 %v1537_v14 }
  0x80   :  { %1428 = vmatpush3.bf16.msra.mxu1 %v1538_v15  ;;  %1407 = vmatprep.subr.bf16.mxu0 %v1539_v16 }
  0x81   :  { %1429 = vmatprep.subr.bf16.mxu1 %v1540_v17 }
  0x83   :  { %1408 = vmatpush3.bf16.msra.mxu0 %v1541_v18 }
  0x84   :  { %1430 = vmatpush3.bf16.msra.mxu1 %v1542_v19  ;;  %1409 = vmatprep.subr.bf16.mxu0 %v1543_v20 }
  0x85   :  { %1431 = vmatprep.subr.bf16.mxu1 %v1544_v21 }
  0x87   :  { %1410 = vmatpush3.bf16.msra.mxu0 %v1545_v22  ;;  %v1305_v22 = vld [vmem:[#allocation8] ss:$0 sm:$0xff] }
  0x88   :  { %1432 = vmatpush3.bf16.msra.mxu1 %v1546_v23  ;;  %1411 = vmatprep.subr.bf16.mxu0 %v1547_v24 }
  0x89   :  { %1433 = vmatprep.subr.bf16.mxu1 %v1548_v25 }
  0x8b   :  { %1412 = vmatpush3.bf16.msra.mxu0 %v1549_v26 }
  0x8c   :  { %1434 = vmatpush3.bf16.msra.mxu1 %v1550_v27  ;;  %1413 = vmatprep.subr.bf16.mxu0 %v1551_v28 }
  0x8d   :  { %1435 = vmatprep.subr.bf16.mxu1 %v1552_v29 }
  0x8f   :  { %1414 = vmatpush3.bf16.msra.mxu0 %v1553_v30 }
  0x90   :  { %1436 = vmatpush3.bf16.msra.mxu1 %v1554_v31  ;;  %1415 = vmatprep.subr.bf16.mxu0 %v1555_v32 }
  0x91   :  { %1437 = vmatprep.subr.bf16.mxu1 %v1556_v33 }
  0x93   :  { %1416 = vmatpush3.bf16.msra.mxu0 %v1557_v34 }
  0x94   :  { %1438 = vmatpush3.bf16.msra.mxu1 %v1558_v35  ;;  %1417 = vmatprep.subr.bf16.mxu0 %v1559_v36 }
  0x95   :  { %1439 = vmatprep.subr.bf16.mxu1 %v1560_v37 }
  0x97   :  { %1418 = vmatpush3.bf16.msra.mxu0 %v1561_v38 }
  0x98   :  { %1440 = vmatpush3.bf16.msra.mxu1 %v1562_v39 }
  0x9a   :  { %1100 = vmatmul.mubr.bf16.vlgmr.msra.gmra.mrb[8].mxu0 %v1563_v40 }
  0x9b   :  { %1141 = vmatmul.mubr.bf16.vlgmr.msra.gmra.mrb[8].mxu1 %v1566_v42 }
 0x12d   :  { %v1331_v44 = vpop.f32.mrb[0].mxu0 }
 0x12e   :  { %v1353_v45 = vpop.f32.mrb[0].mxu1  ;;  %v1332_v46 = vpop.f32.mrb[1].mxu0 }
 0x12f   :  { %v1333_v47 = vadd.f32 %v1332_v46, %v1331_v44  ;;  %v1354_v48 = vpop.f32.mrb[1].mxu1  ;;  %v1334_v49 = vpop.f32.mrb[2].mxu0 }
 0x130   :  { %v1355_v50 = vadd.f32 %v1354_v48, %v1353_v45  ;;  %v1356_v51 = vpop.f32.mrb[2].mxu1  ;;  %v1335_v52 = vpop.f32.mrb[3].mxu0 }
 0x131   :  { %v1336_v53 = vadd.f32 %v1335_v52, %v1334_v49  ;;  %v1357_v54 = vpop.f32.mrb[3].mxu1 }
 0x132   :  { %v979_v55 = vadd.f32 %v1355_v50, %v1333_v47  ;;  %v1358_v56 = vadd.f32 %v1357_v54, %v1356_v51 }
 0x134   :  { %v982_v57 = vadd.f32 %v1358_v56, %v1336_v53 }
 0x14d   :  { %v1375_v58 = vpop.f32.mrb[4].mxu0 }
 0x14e   :  { %v1376_v59 = vpop.f32.mrb[5].mxu0  ;;  %v1397_v60 = vpop.f32.mrb[4].mxu1 }
 0x14f   :  { %v1377_v61 = vadd.f32 %v1376_v59, %v1375_v58  ;;  %v1378_v62 = vpop.f32.mrb[6].mxu0  ;;  %v1398_v63 = vpop.f32.mrb[5].mxu1 }
 0x150   :  { %v1379_v0 = vpop.f32.mrb[7].mxu0  ;;  %v1399_v2 = vadd.f32 %v1398_v63, %v1397_v60  ;;  %v1400_v3 = vpop.f32.mrb[6].mxu1 }
 0x151   :  { %v1020_v1 = vadd.f32 %v1377_v61, %v979_v55  ;;  %v1380_v4 = vadd.f32 %v1379_v0, %v1378_v62  ;;  %v1401_v5 = vpop.f32.mrb[7].mxu1 }
 0x152   :  { %v1402_v8 = vadd.f32 %v1401_v5, %v1400_v3 }
 0x153   :  { %v1061_v6 = vadd.f32 %v1399_v2, %v1020_v1  ;;  %v1023_v7 = vadd.f32 %v1380_v4, %v982_v57 }
 0x155   :  { %v1064_v9 = vadd.f32 %v1402_v8, %v1023_v7 }
 0x16d   :  { %v1419_v10 = vpop.f32.mrb[8].mxu0 }
 0x16e   :  { %v1441_v11 = vpop.f32.mrb[8].mxu1  ;;  %v1420_v12 = vpop.f32.mrb[9].mxu0 }
 0x16f   :  { %v1421_v13 = vadd.f32 %v1420_v12, %v1419_v10  ;;  %v1442_v14 = vpop.f32.mrb[9].mxu1  ;;  %v1422_v15 = vpop.f32.mrb[10].mxu0 }
 0x170   :  { %v1443_v16 = vadd.f32 %v1442_v14, %v1441_v11  ;;  %v1444_v17 = vpop.f32.mrb[10].mxu1  ;;  %v1423_v18 = vpop.f32.mrb[11].mxu0 }
 0x171   :  { %v1102_v19 = vadd.f32 %v1421_v13, %v1061_v6  ;;  %v1424_v20 = vadd.f32 %v1423_v18, %v1422_v15  ;;  %v1445_v21 = vpop.f32.mrb[11].mxu1 }
 0x172   :  { %v1446_v23 = vadd.f32 %v1445_v21, %v1444_v17 }
 0x173   :  { %v1143_v24 = vadd.f32 %v1443_v16, %v1102_v19  ;;  %v1105_v25 = vadd.f32 %v1424_v20, %v1064_v9 }
 0x175   :  { %v1165_v26 = vadd.f32 %v1305_v22, %v1143_v24  ;;  %v1146_v27 = vadd.f32 %v1446_v23, %v1105_v25 }
 0x177   :  { %v1166_v28 = vadd.f32 %v1305_v22, %v1146_v27  ;;  %v1167_v29 = vmax.f32 %v1165_v26, 0.0 }
 0x179   :  { %v1168_v30 = vmax.f32 %v1166_v28, 0.0 }
 0x17b   :  { %v1313_v31 = vpack.c.bf16 %v1168_v30, %v1167_v29 }
 0x17d   :  { %1314 = vst [vmem:[#allocation9] sm:$0xff] %v1313_v31  }
 0x17e   :  { %1646 = shalt.err (!%p1643_p0)
}
 0x17f   :  { %s1647_s30 = scalar_lea.hbm %s1748_s3, 128 }
 0x180   :  { %p1648_p1 = scmp.ne.s32.totalorder %s1748_s3, %s1647_s30  ;;  %p1651_p2 = scmp.lt.u32.totalorder %s1647_s30, %s1748_s3 }
 0x182   :  { %p1653_p3 = pnand %p1651_p2, %p1648_p1 }
 0x184   :  { %1656 = shalt.err (!%p1653_p3)
}
 0x185   :  { %1190 = dma.vmem_to_hbm [thread:$0]  %s1185_s26, 128, %s1748_s3, [#allocation5], %s1664_s22, %s1664_s22, %s1665_s23  }
 0x186   :  { %1661 = dma.done.wait [#allocation5], 128  }
 0x187   :  { %1662 = vsyncadd [#allocation5], 4294967168 }
 0x188   :  { %1194 = vsyncpa [#allocation4], 1 }
 0x189   :  { %1195 = vsyncpa [#allocation7], 1 }
 0x18a   :  { %1196 = vsyncpa [#allocation5], 1 }

</bundles_post_ra>
